<compile_context>
chip_gen: v7x
topology: tpu7x:2x2x1
jax: 0.10.0
libtpu: 0.0.40
codegen_flags: <defaults>
</compile_context>

<pallas_src>
import numpy as np
import jax
import jax.numpy as jnp
from jax import lax
from jax.experimental import pallas as pl
from jax.experimental.pallas import tpu as pltpu


# ----------------------------------------------------------------------------
# Pallas kernel (per (batch, hw-tile) grid step, all operands resident in VMEM)
# ----------------------------------------------------------------------------
def _csph1d_kernel(x_ref, ct_ref, znd_ref, zncc_ref, b_ref):
    x = x_ref[0]           # (NT, T)  native bin-major histogram tile
    Ct = ct_ref[...]       # (K, NT)  coding matrix, pre-transposed in the wrapper
    znD = znd_ref[...]     # (NT, K)  zero-normed decoding matrix (precomputed)

    # Encode in native layout: Bt[k, p] = sum_t Cmat[t, k] * x[t, p]   (MXU)
    bt = jnp.dot(Ct, x, preferred_element_type=jnp.float32)            # (K, T)

    # zero_norm_vec(B, dim=-1) == zero-norm over the K axis in this layout.
    b_zm = bt - jnp.mean(bt, axis=0, keepdims=True)
    b_nrm = jnp.sqrt(jnp.sum(b_zm * b_zm, axis=0, keepdims=True)) + 1e-6
    zn_b = b_zm / b_nrm                                                 # (K, T)

    # Decode (ZNCC): zncc_t[t, p] = sum_k znD[t, k] * zn_b[k, p]        (MXU)
    zncc_ref[0] = jnp.dot(znD, zn_b, preferred_element_type=jnp.float32)  # (NT, T)
    b_ref[0] = bt                                                          # (K, T)


# ----------------------------------------------------------------------------
# pallas_call wrapper: tiling / padding / VMEM budgeting
# ----------------------------------------------------------------------------
def csph1d_pallas(x_bhw, Cmat_t, zn_Dmat, *, tile_hw=1024):
    """x_bhw: (bs, nt, HW) f32.  Cmat_t: (K, nt).  zn_Dmat: (nt, K).
    Returns zncc (bs, nt, HW) and Bt (bs, K, HW)."""
    bs, nt, HW = x_bhw.shape
    K, ntc = Cmat_t.shape
    assert nt == ntc
    assert tile_hw % 128 == 0

    if HW <= tile_hw:
        # Single tile covering the whole (flattened) spatial extent.
        # A block dim equal to the full array dim is exempt from the 128-lane rule.
        tile = HW
        hw_pad = HW
    else:
        tile = tile_hw
        # Keep the double-buffered working set comfortably under v7x's 64 MiB VMEM
        # (v5e/v6e have 128 MiB; this budget is safe on all three generations).
        budget = 40 * 1024 * 1024

        def _vmem_est(t):
            # 2x-buffered X + zncc + B blocks (f32) plus the two small matrices.
            return 4 * (2 * (nt * t + nt * t + K * t) + 2 * 2 * nt * K)

        while tile > 128 and _vmem_est(tile) > budget:
            tile = max(128, (tile // 2 // 128) * 128)
        hw_pad = ((HW + tile - 1) // tile) * tile
        if hw_pad != HW:
            # Zero-pad the tail tile (zero columns produce zncc == 0, no NaNs; sliced off below).
            x_bhw = jnp.pad(x_bhw, ((0, 0), (0, 0), (0, hw_pad - HW)))

    grid = (bs, hw_pad // tile)

    zncc, bt = pl.pallas_call(
        _csph1d_kernel,
        out_shape=(
            jax.ShapeDtypeStruct((bs, nt, hw_pad), jnp.float32),
            jax.ShapeDtypeStruct((bs, K, hw_pad), jnp.float32),
        ),
        grid=grid,
        in_specs=[
            pl.BlockSpec((1, nt, tile), lambda b, j: (b, 0, j)),   # X tile (bin-major)
            pl.BlockSpec((K, nt), lambda b, j: (0, 0)),            # Cmat^T (whole, small, resident)
            pl.BlockSpec((nt, K), lambda b, j: (0, 0)),            # zero-normed decode mat
        ],
        out_specs=(
            pl.BlockSpec((1, nt, tile), lambda b, j: (b, 0, j)),   # zncc tile (lane-dense)
            pl.BlockSpec((1, K, tile), lambda b, j: (b, 0, j)),    # Bt tile (lane-dense)
        ),
        compiler_params=pltpu.CompilerParams(
            dimension_semantics=("parallel", "parallel"),
            vmem_limit_bytes=48 * 1024 * 1024,
        ),
    )(x_bhw, Cmat_t, zn_Dmat)

    if hw_pad != HW:
        zncc = zncc[:, :, :HW]
        bt = bt[:, :, :HW]
    return zncc, bt


# ----------------------------------------------------------------------------
# Module-level forward (only free reshapes + a tiny B transpose around the kernel)
# ----------------------------------------------------------------------------
def _zero_norm(v, axis=-1):
    zm = v - jnp.mean(v, axis=axis, keepdims=True)
    return zm / (jnp.linalg.norm(zm, ord=2, axis=axis, keepdims=True) + 1e-6)


def csph1d_forward(inputs, Cmat, decoding_Cmat, *, tile_hw=1024):
    """inputs: (bs, 1, nt, H, W) f32 -> (zncc (bs, 1, nt, H, W), B (bs, k, W, H))."""
    bs, c, nt, H, W = inputs.shape
    assert c == 1
    k = Cmat.shape[1]
    HW = H * W

    # Free (contiguous) reshape — input stays in its native bin-major layout.
    x_bhw = inputs.reshape(bs, nt, HW)

    # Grid-invariant preprocessing, hoisted out of the kernel (tiny: nt x k each):
    #  - transpose of the coding matrix (so the kernel runs a plain MXU matmul)
    #  - zero-norm of the decoding matrix
    Cmat_t = jnp.transpose(Cmat.astype(jnp.float32))                 # (k, nt)
    zn_D = _zero_norm(decoding_Cmat.astype(jnp.float32), axis=-1)    # (nt, k)

    zncc_flat, bt_flat = csph1d_pallas(x_bhw, Cmat_t, zn_D, tile_hw=tile_hw)

    # zncc already matches the torch output layout (bin-major) — just reshape.
    zncc = zncc_flat.reshape(bs, 1, nt, H, W)

    # Torch returns B as (bs, k, W, H): only the tiny B tensor needs an H<->W swap.
    B = bt_flat.reshape(bs, k, H, W)
    B = jnp.swapaxes(B, -1, -2)                                      # (bs, k, W, H)
    return zncc, B


# ----------------------------------------------------------------------------
# Deterministic parameter init (TruncFourier-style: cos/sin harmonic pairs,
# no zeroth harmonic; decoding matrix equals the coding matrix).
# ----------------------------------------------------------------------------
def make_trunc_fourier_cmat(num_bins, k):
    assert k % 2 == 0, "TruncFourier init uses cos/sin pairs"
    t = jnp.arange(num_bins, dtype=jnp.float32) / float(num_bins)
    cols = []
    for h in range(1, k // 2 + 1):
        cols.append(jnp.cos(2.0 * jnp.pi * h * t))
        cols.append(jnp.sin(2.0 * jnp.pi * h * t))
    return jnp.stack(cols, axis=-1).astype(jnp.float32)              # (num_bins, k)


# ----------------------------------------------------------------------------
# Pure-JAX reference (mirrors the torch code) for the correctness check.
# ----------------------------------------------------------------------------
def csph1d_reference(inputs, Cmat, decoding_Cmat):
    xr = jnp.swapaxes(inputs, -3, -1)
    B = xr @ Cmat
    zncc = _zero_norm(B, -1) @ _zero_norm(decoding_Cmat, -1).T
    zncc = jnp.swapaxes(zncc, -3, -1)
    Bout = jnp.squeeze(jnp.swapaxes(B, -1, -4), -1)
    return zncc, Bout


if __name__ == "__main__":
    # Small shapes consistent with the module's forward.
    bs, num_bins, H, W, k = 2, 128, 16, 16, 4

    key = jax.random.PRNGKey(0)
    # Synthetic photon-count-like histograms (non-negative).
    inputs = jax.random.uniform(key, (bs, 1, num_bins, H, W), dtype=jnp.float32)

    Cmat = make_trunc_fourier_cmat(num_bins, k)                      # (num_bins, k)
    decoding_Cmat = Cmat                                             # TruncFourier: decode == encode

    zncc, B = csph1d_forward(inputs, Cmat, decoding_Cmat)
    zncc = jax.block_until_ready(zncc)
    B = jax.block_until_ready(B)

    # Correctness check vs. the pure-JAX mirror of the torch forward.
    zncc_ref, B_ref = csph1d_reference(inputs, Cmat, decoding_Cmat)
    assert zncc.shape == (bs, 1, num_bins, H, W)
    assert B.shape == (bs, k, W, H)
    np.testing.assert_allclose(np.asarray(zncc), np.asarray(zncc_ref), atol=1e-4, rtol=1e-4)
    np.testing.assert_allclose(np.asarray(B), np.asarray(B_ref), atol=1e-4, rtol=1e-4)

    print("KERNEL_OK")
</pallas_src>

<mosaic_0001>
module attributes {stable_mosaic.version = 11 : i64} {
  func.func @_csph1d_kernel(%arg0: i32, %arg1: i32, %arg2: memref<1x128x256xf32, #tpu.memory_space<vmem>>, %arg3: memref<4x128xf32, #tpu.memory_space<vmem>>, %arg4: memref<128x4xf32, #tpu.memory_space<vmem>>, %arg5: memref<1x128x256xf32, #tpu.memory_space<vmem>>, %arg6: memref<1x4x256xf32, #tpu.memory_space<vmem>>) attributes {dimension_semantics = [#tpu.dimension_semantics<parallel>, #tpu.dimension_semantics<parallel>], iteration_bounds = array<i64: 2, 1>, scalar_prefetch = 0 : i64, scratch_operands = 0 : i64, tpu.core_type = #tpu.core_type<tc>, window_params = [{transform_indices = @transform_0, window_bounds = array<i64: 1, 128, 256>}, {pipeline_mode = #tpu.pipeline_mode<synchronous>, transform_indices = @transform_1, window_bounds = array<i64: 4, 128>}, {pipeline_mode = #tpu.pipeline_mode<synchronous>, transform_indices = @transform_2, window_bounds = array<i64: 128, 4>}, {transform_indices = @transform_3, window_bounds = array<i64: 1, 128, 256>}, {transform_indices = @transform_4, window_bounds = array<i64: 1, 4, 256>}]} {
    %c0 = arith.constant 0 : index
    %c0_0 = arith.constant 0 : index
    %c0_1 = arith.constant 0 : index
    %0 = vector.load %arg2[%c0, %c0_0, %c0_1] : memref<1x128x256xf32, #tpu.memory_space<vmem>>, vector<1x128x256xf32>
    %1 = vector.shape_cast %0 : vector<1x128x256xf32> to vector<128x256xf32>
    %c0_2 = arith.constant 0 : index
    %c0_3 = arith.constant 0 : index
    %2 = vector.load %arg3[%c0_2, %c0_3] : memref<4x128xf32, #tpu.memory_space<vmem>>, vector<4x128xf32>
    %c0_4 = arith.constant 0 : index
    %c0_5 = arith.constant 0 : index
    %3 = vector.load %arg4[%c0_4, %c0_5] : memref<128x4xf32, #tpu.memory_space<vmem>>, vector<128x4xf32>
    %cst = arith.constant dense<0.000000e+00> : vector<4x256xf32>
    %4 = tpu.matmul %2, %1, %cst {dimension_numbers = #tpu.dot_dimension_numbers<[1], [0], [0], [1], [0, 0, 1, 1], [], []>} : vector<4x128xf32>, vector<128x256xf32>, vector<4x256xf32> -> vector<4x256xf32>
    %cst_6 = arith.constant dense<0.000000e+00> : vector<256xf32>
    %5 = vector.multi_reduction <add>, %4, %cst_6 [0] : vector<4x256xf32> to vector<256xf32>
    %6 = vector.shape_cast %5 : vector<256xf32> to vector<1x256xf32>
    %cst_7 = arith.constant 4.000000e+00 : f32
    %7 = vector.broadcast %cst_7 : f32 to vector<1x256xf32>
    %8 = arith.divf %6, %7 : vector<1x256xf32>
    %9 = vector.broadcast %8 : vector<1x256xf32> to vector<4x256xf32>
    %10 = arith.subf %4, %9 : vector<4x256xf32>
    %11 = arith.mulf %10, %10 : vector<4x256xf32>
    %cst_8 = arith.constant dense<0.000000e+00> : vector<256xf32>
    %12 = vector.multi_reduction <add>, %11, %cst_8 [0] : vector<4x256xf32> to vector<256xf32>
    %13 = vector.shape_cast %12 : vector<256xf32> to vector<1x256xf32>
    %14 = math.sqrt %13 : vector<1x256xf32>
    %cst_9 = arith.constant 9.99999997E-7 : f32
    %15 = vector.broadcast %cst_9 : f32 to vector<1x256xf32>
    %16 = arith.addf %14, %15 : vector<1x256xf32>
    %17 = vector.broadcast %16 : vector<1x256xf32> to vector<4x256xf32>
    %18 = arith.divf %10, %17 : vector<4x256xf32>
    %cst_10 = arith.constant dense<0.000000e+00> : vector<128x256xf32>
    %19 = tpu.matmul %3, %18, %cst_10 {dimension_numbers = #tpu.dot_dimension_numbers<[1], [0], [0], [1], [0, 0, 1, 1], [], []>} : vector<128x4xf32>, vector<4x256xf32>, vector<128x256xf32> -> vector<128x256xf32>
    %c0_11 = arith.constant 0 : index
    %c0_12 = arith.constant 0 : index
    %c0_13 = arith.constant 0 : index
    %20 = vector.load %arg5[%c0_11, %c0_12, %c0_13] : memref<1x128x256xf32, #tpu.memory_space<vmem>>, vector<1x128x256xf32>
    %21 = vector.shape_cast %20 : vector<1x128x256xf32> to vector<128x256xf32>
    %22 = vector.shape_cast %19 : vector<128x256xf32> to vector<1x128x256xf32>
    tpu.vector_store %arg5[%c0_11, %c0_12, %c0_13], %22 {strides = array<i32>} : memref<1x128x256xf32, #tpu.memory_space<vmem>>, vector<1x128x256xf32>,
    %c0_14 = arith.constant 0 : index
    %c0_15 = arith.constant 0 : index
    %c0_16 = arith.constant 0 : index
    %23 = vector.load %arg6[%c0_14, %c0_15, %c0_16] : memref<1x4x256xf32, #tpu.memory_space<vmem>>, vector<1x4x256xf32>
    %24 = vector.shape_cast %23 : vector<1x4x256xf32> to vector<4x256xf32>
    %25 = vector.shape_cast %4 : vector<4x256xf32> to vector<1x4x256xf32>
    tpu.vector_store %arg6[%c0_14, %c0_15, %c0_16], %25 {strides = array<i32>} : memref<1x4x256xf32, #tpu.memory_space<vmem>>, vector<1x4x256xf32>,
    return
  }
  func.func @transform_0(%arg0: i32, %arg1: i32) -> (i32, i32, i32) {
    %c0_i32 = arith.constant 0 : i32
    %c0_i32_0 = arith.constant 0 : i32
    return %arg0, %c0_i32, %arg1 : i32, i32, i32
  }
  func.func @transform_1(%arg0: i32, %arg1: i32) -> (i32, i32) {
    %c0_i32 = arith.constant 0 : i32
    %c0_i32_0 = arith.constant 0 : i32
    %c0_i32_1 = arith.constant 0 : i32
    return %c0_i32, %c0_i32_0 : i32, i32
  }
  func.func @transform_2(%arg0: i32, %arg1: i32) -> (i32, i32) {
    %c0_i32 = arith.constant 0 : i32
    %c0_i32_0 = arith.constant 0 : i32
    %c0_i32_1 = arith.constant 0 : i32
    return %c0_i32, %c0_i32_0 : i32, i32
  }
  func.func @transform_3(%arg0: i32, %arg1: i32) -> (i32, i32, i32) {
    %c0_i32 = arith.constant 0 : i32
    %c0_i32_0 = arith.constant 0 : i32
    return %arg0, %c0_i32, %arg1 : i32, i32, i32
  }
  func.func @transform_4(%arg0: i32, %arg1: i32) -> (i32, i32, i32) {
    %c0_i32 = arith.constant 0 : i32
    %c0_i32_0 = arith.constant 0 : i32
    return %arg0, %c0_i32, %arg1 : i32, i32, i32
  }
}

</mosaic_0001>

<bundles_post_ra>
// kernel: tpu_custom_call.1
= control target key start
LH: loop header
LB: loop body
LE: loop exit
PB: predicated region body
PF: predicated region fallthrough
CT: control target
= control target key end

     0   :  { %10 = vsyncpa [#allocation3], 0  ;;  %s1540_s0 = inlined_call_operand.hbm [shape: f32[2,128,256], index: 0, kind: input, shape index: {}]   ;;  %s1541_s1 = inlined_call_operand.vmem [shape: f32[4,128], index: 1, kind: input, shape index: {}]   ;;  %s1542_s2 = inlined_call_operand.vmem [shape: f32[128,4], index: 2, kind: input, shape index: {}]   ;;  %s1543_s3 = inlined_call_operand.hbm [shape: f32[2,128,256], index: 3, kind: output, shape index: {0}]   ;;  %s1544_s4 = inlined_call_operand.hbm [shape: f32[2,4,256], index: 4, kind: output, shape index: {1}]  }
   0x1   :  { %12 = vsyncpa [#allocation3 + $0x1], 0 }
   0x2   :  { %13 = vsyncpa [#allocation4], 0 }
   0x3   :  { %15 = vsyncpa [#allocation4 + $0x1], 0 }
   0x4   :  { %16 = vsyncpa [#allocation7], 0 }
   0x5   :  { %18 = vsyncpa [#allocation7 + $0x1], 0  ;;  %s1171_s15 = smov 0   ;;  %s1173_s16 = smov 0  }
   0x6   :  { %s1175_s17 = smov 0   ;;  %s1177_s18 = smov 0  }
   0x7   :  { %s1179_s19 = smov 0   ;;  %s1181_s20 = smov 0  }
   0x8 LB: > { %s838_s21 = sadd.s32 4294967295, %s1136_s20   ;;  %s839_s22 = sadd.s32 4294967294, %s1136_s20   ;;  %s1136_s20 = sphi %s1181_s20, %s24_s20   ;;  %s1132_s19 = sphi %s1179_s19, %s1559_s19   ;;  %s1128_s18 = sphi %s1177_s18, %s1558_s18   ;;  %s1124_s17 = sphi %s1175_s17, %s1557_s17   ;;  %s1120_s16 = sphi %s1173_s16, %s1556_s16   ;;  %s1116_s15 = sphi %s1171_s15, %s1555_s15  }
   0x9   : > { %s36_s23 = sadd.s32 1, %s1132_s19  ;;  %s45_s24 = sadd.s32 1, %s1124_s17 }
   0xa   : > { %p38_p0 = scmp.ge.s32.totalorder %s36_s23, 2  ;;  %p52_p1 = scmp.ne.s32.totalorder %s1124_s17, %s1120_s16 }
   0xb   : > { %p53_p2 = scmp.eq.s32.totalorder %s1136_s20, 0  ;;  %p58_p3 = scmp.ne.s32.totalorder %s1120_s16, %s1116_s15 }
   0xc   : > { %s1561_s23 = smov (%p38_p0, %s36_s23), 0  ;;  %p59_p5 = scmp.eq.s32.totalorder %s838_s21, 0 }
   0xd   : > { %p1212_p4 = por %p53_p2, %p52_p1  ;;  %s40_s26 = ssub.s32 %s1132_s19, %s1561_s23 }
   0xe   : > { %p126_p6 = scmp.eq.s32.totalorder %s838_s21, 1  ;;  %p43_p7 = scmp.eq.s32.totalorder %s40_s26, 0 }
   0xf   : > { %p1218_p8 = por %p59_p5, %p58_p3  ;;  %p132_p10 = scmp.eq.s32.totalorder %s839_s22, 1 }
  0x10   : > { %p1222_p9 = por %p126_p6, %p52_p1  ;;  %p929_p13 = scmp.lt.s32.totalorder %s1136_s20, 2 }
  0x11   : > { %s1227_s29 = scalar_select %p43_p7, %s1124_s17, %s45_s24  }
  0x12   : > { %s1548_s28 = scalar_select %p1222_p9, 1, 0 }
  0x13   : > { %p1229_p11 = por %p132_p10, %p58_p3  ;;  %s186_s5 = sand.u32 1, %s1124_s17  }
  0x14   : > { %s842_s6 = sshll.u32 %s186_s5, 8  ;;  %s875_s7 = sshll.u32 %s1132_s19, 12 }
  0x15   : > { %s1549_s30 = scalar_select %p1229_p11, 1, 0 }
  0x16   : > { %s1240_s10 = scalar_lea.hbm %s1540_s0, %s875_s7  ;;  %s190_s11 = scalar_lea.vmem [#allocation2], %s842_s6 }
  0x17   : > { %s199_s12 = sshll.u32 %s190_s11, 4  ;;  %p1246_p0 = pnand %p929_p13, %p1212_p4  ;;  %s1242_s12 = int_to_ptr.vmem [resolvable:$true] %s199_s12 }
  0x18   : > { %s1251_s14 = scalar_lea.sflag [#allocation3], %s186_s5  ;;  %s992_s21 = scalar_lea.hbm %s1240_s10, 4096 }
  0x19   : > { %p993_p2 = scmp.ne.s32.totalorder %s1240_s10, %s992_s21  ;;  %p994_p3 = pneg %p1246_p0 }
  0x1a   : > { %s997_s25 = scalar_lea.hbm %s1540_s0, 8192  ;;  %p998_p4 = scmp.lt.u32.totalorder %s1240_s10, %s1540_s0 }
  0x1b   : > { %p995_p5 = pnand %p994_p3, %p993_p2  ;;  %p999_p7 = scmp.lt.u32.totalorder %s997_s25, %s992_s21 }
  0x1c   : > { %p1001_p13 = scmp.lt.u32.totalorder %s992_s21, %s1240_s10 }
  0x1d   : > { %p996_p6 = pneg %p995_p5  ;;  %p1000_p10 = por %p999_p7, %p998_p4 }
  0x1f   : > { %p1002_p12 = por %p1001_p13, %p1000_p10 }
  0x21   : > { %p1003_p1 = pnand %p1002_p12, %p996_p6 }
  0x23   : > { %1006 = shalt.err (!%p1003_p1)
}
  0x24   : > { %s1007_s5 = scalar_lea.vmem %s1242_s12, 4096  ;;  %s1138_s7 = smov [#allocation2]  }
  0x25   : > { %p1008_p2 = scmp.ne.s32.totalorder %s1242_s12, %s1007_s5  ;;  %s1012_s8 = sshll.u32 %s1138_s7, 4  ;;  %s1013_s8 = int_to_ptr.vmem [resolvable:$false] %s1012_s8 }
  0x26   : > { %s1014_s9 = scalar_lea.vmem %s1013_s8, 8192  ;;  %p1015_p9 = scmp.lt.s32.totalorder %s1242_s12, %s1013_s8 }
  0x27   : > { %p1010_p5 = pnand %p1008_p2, %p994_p3  ;;  %p1016_p4 = scmp.lt.s32.totalorder %s1014_s9, %s1007_s5 }
  0x29   : > { %p1011_p11 = pneg %p1010_p5  ;;  %p1017_p7 = por %p1016_p4, %p1015_p9 }
  0x2b   : > { %p1018_p10 = pnand %p1017_p7, %p1011_p11 }
  0x2d   : > { %1021 = shalt.err (!%p1018_p10)
}
  0x2e   : > { %s1139_s11 = smov 256   ;;  %s1140_s21 = smov 16  }
  0x2f   : > { %921 = dma.hbm_to_vmem [thread:$0]  (!%p1246_p0), %s1240_s10, 4096, %s1242_s12, %s1251_s14, %s1139_s11, %s1139_s11, %s1140_s21  }
  0x30   : > { %p207_p12 = scmp.lt.s32.totalorder %s1136_s20, 3  ;;  %p1551_p1 = scmp.ge.s32.totalorder %s1136_s20, 1 }
  0x32   : > { %p208_p3 = pnand %p1551_p1, %p207_p12 }
  0x33   : > { %s1283_s22 = sand.u32 (!%p208_p3), 1, %s1120_s16  }
  0x34   : > { %211 = sbr.rel (%p208_p3) target bundleno = 648 (0x288), region = 32  ;;  %s846_s24 = sshll.u32 (!%p208_p3), %s1283_s22, 8 }
  0x35   : > { %s214_s25 = scalar_lea.sflag (!%p208_p3), [#allocation3], %s1283_s22  ;;  %s1289_s26 = scalar_lea.vmem (!%p208_p3), [#allocation2], %s846_s24 }
  0x3b   : > { %1103 = dma.done.wait (%p1218_p8), %s214_s25, 4096  }
  0x3c   : > { %1105 = vsyncadd (%p1218_p8), %s214_s25, 4294963200  ;;  %v1141_v0 = vmov 0.0   ;;  %v251_v1 = vld [vmem:[%s1289_s26 + $0x8] sm:$0xff]  ;;  %v253_v2 = vld [vmem:[%s1289_s26 + $0x18] sm:$0xff]  ;;  %vm370_vm0 = vcmask 1043456   ;;  %s848_s12 = sshll.u32 %s1283_s22, 3 }
  0x3d   : > { %363 = vmatprep.mubr.f32.mxu0 %v1141_v0  ;;  %563 = vmatprep.mubr.f32.mxu1 %v1141_v0  ;;  %v250_v3 = vld [vmem:[%s1289_s26] sm:$0xff]  ;;  %v878_v4 = vpack.c.bf16 %v253_v2, %v251_v1  ;;  %v252_v5 = vld [vmem:[%s1289_s26 + $0x10] sm:$0xff]  ;;  %v255_v6 = vld [vmem:[%s1289_s26 + $0x28] sm:$0xff]  ;;  %s1336_s13 = scalar_lea.vmem [#allocation6], %s848_s12  ;;  %vm426_vm5 = vcmask 31744   ;;  %s877_s11 = sshll.u32 %s1128_s18, 7 }
  0x3e   : > { %v257_v7 = vld [vmem:[%s1289_s26 + $0x38] sm:$0xff]  ;;  %v880_v8 = vpack.c.bf16 %v252_v5, %v250_v3  ;;  %v254_v10 = vld [vmem:[%s1289_s26 + $0x20] sm:$0xff]  ;;  %v256_v11 = vld [vmem:[%s1289_s26 + $0x30] sm:$0xff]  ;;  %s719_s21 = sshll.u32 %s1336_s13, 4  ;;  %s1428_s27 = scalar_lea.hbm %s1544_s4, %s877_s11  ;;  %s720_s21 = int_to_ptr.vmem [resolvable:$true] %s719_s21 }
  0x3f   : > { %v882_v9 = vpack.c.bf16 %v257_v7, %v255_v6  ;;  %v259_v12 = vld [vmem:[%s1289_s26 + $0x48] sm:$0xff]  ;;  %879 = vmatprep.subr.bf16.mxu0 %v878_v4  ;;  %v261_v13 = vld [vmem:[%s1289_s26 + $0x58] sm:$0xff]  ;;  %v884_v14 = vpack.c.bf16 %v256_v11, %v254_v10  ;;  %v258_v16 = vld [vmem:[%s1289_s26 + $0x40] sm:$0xff]  ;;  %s685_s10 = scalar_lea.sflag [#allocation7], %s1283_s22  ;;  %s1022_s12 = scalar_lea.vmem %s720_s21, 128 }
  0x40   : > { %881 = vmatpush1.bf16.msra.mxu0 %v880_v8  ;;  %v886_v15 = vpack.c.bf16 %v261_v13, %v259_v12  ;;  %v260_v17 = vld [vmem:[%s1289_s26 + $0x50] sm:$0xff]  ;;  %v263_v18 = vld [vmem:[%s1289_s26 + $0x68] sm:$0xff]  ;;  %v265_v19 = vld [vmem:[%s1289_s26 + $0x78] sm:$0xff]  ;;  %p1023_p8 = scmp.ne.s32.totalorder %s720_s21, %s1022_s12  ;;  %p1552_p9 = scmp.ne.s32.totalorder %s1548_s28, 0 }
  0x41   : > { %883 = vmatprep.subr.bf16.mxu0 %v882_v9  ;;  %v888_v20 = vpack.c.bf16 %v260_v17, %v258_v16  ;;  %v890_v21 = vpack.c.bf16 %v265_v19, %v263_v18  ;;  %v262_v22 = vld [vmem:[%s1289_s26 + $0x60] sm:$0xff]  ;;  %v264_v23 = vld [vmem:[%s1289_s26 + $0x70] sm:$0xff]  ;;  %v267_v24 = vld [vmem:[%s1289_s26 + $0x88] sm:$0xff]  ;;  %s1142_s14 = smov [#allocation6]  }
  0x42   : > { %v269_v25 = vld [vmem:[%s1289_s26 + $0x98] sm:$0xff]  ;;  %v892_v26 = vpack.c.bf16 %v264_v23, %v262_v22  ;;  %v266_v28 = vld [vmem:[%s1289_s26 + $0x80] sm:$0xff]  ;;  %v268_v29 = vld [vmem:[%s1289_s26 + $0x90] sm:$0xff]  ;;  %p1024_p11 = pnand %p1023_p8, %p1552_p9  ;;  %s1026_s6 = sshll.u32 %s1142_s14, 4  ;;  %s1027_s6 = int_to_ptr.vmem [resolvable:$false] %s1026_s6 }
  0x43   : > { %v894_v27 = vpack.c.bf16 %v269_v25, %v267_v24  ;;  %v271_v30 = vld [vmem:[%s1289_s26 + $0xa8] sm:$0xff]  ;;  %v273_v31 = vld [vmem:[%s1289_s26 + $0xb8] sm:$0xff]  ;;  %v896_v32 = vpack.c.bf16 %v268_v29, %v266_v28  ;;  %v270_v34 = vld [vmem:[%s1289_s26 + $0xa0] sm:$0xff]  ;;  %s1028_s5 = scalar_lea.vmem %s1027_s6, 256  ;;  %p1029_p6 = scmp.lt.s32.totalorder %s720_s21, %s1027_s6 }
  0x44   : > { %885 = vmatpush1.bf16.msra.mxu0 %v884_v14  ;;  %v898_v33 = vpack.c.bf16 %v273_v31, %v271_v30  ;;  %v272_v35 = vld [vmem:[%s1289_s26 + $0xb0] sm:$0xff]  ;;  %v275_v36 = vld [vmem:[%s1289_s26 + $0xc8] sm:$0xff]  ;;  %v277_v37 = vld [vmem:[%s1289_s26 + $0xd8] sm:$0xff]  ;;  %p1025_p0 = pneg %p1024_p11  ;;  %p1030_p13 = scmp.lt.s32.totalorder %s1028_s5, %s1022_s12 }
  0x45   : > { %887 = vmatprep.subr.bf16.mxu0 %v886_v15  ;;  %v900_v38 = vpack.c.bf16 %v272_v35, %v270_v34  ;;  %v902_v39 = vpack.c.bf16 %v277_v37, %v275_v36  ;;  %v274_v40 = vld [vmem:[%s1289_s26 + $0xc0] sm:$0xff]  ;;  %v276_v41 = vld [vmem:[%s1289_s26 + $0xd0] sm:$0xff]  ;;  %v279_v42 = vld [vmem:[%s1289_s26 + $0xe8] sm:$0xff] }
  0x46   : > { %v281_v43 = vld [vmem:[%s1289_s26 + $0xf8] sm:$0xff]  ;;  %v904_v44 = vpack.c.bf16 %v276_v41, %v274_v40  ;;  %v278_v46 = vld [vmem:[%s1289_s26 + $0xe0] sm:$0xff]  ;;  %v280_v47 = vld [vmem:[%s1289_s26 + $0xf0] sm:$0xff]  ;;  %p1031_p2 = por %p1030_p13, %p1029_p6 }
  0x47   : > { %v906_v45 = vpack.c.bf16 %v281_v43, %v279_v42  ;;  %v908_v48 = vpack.c.bf16 %v280_v47, %v278_v46  ;;  %v282_v49 = vld [vmem:[%s1541_s1] sm:$0xf]  ;;  %v286_v40 = vld [vmem:[%s1542_s2 + $0x18] sm:$0xff]  ;;  %v284_v43 = vld [vmem:[%s1542_s2 + $0x8] sm:$0xff] }
  0x48   : > { %889 = vmatpush1.bf16.msra.mxu0 %v888_v20  ;;  %v283_v41 = vld [vmem:[%s1542_s2] sm:$0xff]  ;;  %v289_v46 = vld [vmem:[%s1542_s2 + $0x30] sm:$0xff]  ;;  %v290_v47 = vld [vmem:[%s1542_s2 + $0x38] sm:$0xff]  ;;  %p1032_p5 = pnand %p1031_p2, %p1025_p0 }
  0x49   : > { %891 = vmatprep.subr.bf16.mxu0 %v890_v21  ;;  %v287_v42 = vld [vmem:[%s1542_s2 + $0x20] sm:$0xff] }
  0x4c   : > { %893 = vmatpush1.bf16.msra.mxu0 %v892_v26 }
  0x4d   : > { %895 = vmatprep.subr.bf16.mxu0 %v894_v27 }
  0x50   : > { %897 = vmatpush1.bf16.msra.mxu0 %v896_v32 }
  0x51   : > { %899 = vmatprep.subr.bf16.mxu0 %v898_v33 }
  0x54   : > { %901 = vmatpush1.bf16.msra.mxu0 %v900_v38 }
  0x55   : > { %903 = vmatprep.subr.bf16.mxu0 %v902_v39 }
  0x58   : > { %905 = vmatpush1.bf16.msra.mxu0 %v904_v44  ;;  %v288_v44 = vld [vmem:[%s1542_s2 + $0x28] sm:$0xff] }
  0x59   : > { %907 = vmatprep.subr.bf16.mxu0 %v906_v45  ;;  %v285_v45 = vld [vmem:[%s1542_s2 + $0x10] sm:$0xff] }
  0x5c   : > { %909 = vmatpush1.bf16.msra.mxu0 %v908_v48  ;;  %v291_v48 = vld [vmem:[%s1542_s2 + $0x40] sm:$0xff] }
  0x5f   : > { %364 = vmatmul.mubr.f32.vlgmr.msra.gmra.mrb[0].mxu0 %v282_v49  ;;  %v292_v49 = vld [vmem:[%s1542_s2 + $0x48] sm:$0xff] }
  0x60   : > { %545 = vmatprep.mubr.f32.mxu0 %v1141_v0 }
 0x132   : > { %v365_v50 = vpop.f32.mrb[0].mxu0 }
 0x133   : > { %v371_v51 = vsel %vm370_vm0, %v365_v50, 0.0  ;;  %v367_v52 = vpop.f32.mrb[1].mxu0 }
 0x134   : > { %v372_v53 = vrot.slane %v371_v51, 4  ;;  %v378_v54 = vsel %vm370_vm0, %v367_v52, 0.0  ;;  %v676_v55 = vcombine.low %v365_v50, %v367_v52 }
 0x135   : > { %v379_v56 = vrot.slane %v378_v54, 4 }
 0x136   : > { %v373_v57 = vadd.f32 %v372_v53, %v371_v51  ;;  %678 = vst [vmem:[%s1336_s13] sm:$0xff] %v676_v55  ;;  %v294_v51 = vld [vmem:[%s1542_s2 + $0x58] sm:$0xff]  ;;  %v296_v53 = vld [vmem:[%s1542_s2 + $0x68] sm:$0xff] }
 0x137   : > { %v380_v58 = vadd.f32 %v379_v56, %v378_v54  ;;  %v297_v54 = vld [vmem:[%s1542_s2 + $0x70] sm:$0xff]  ;;  %v298_v55 = vld [vmem:[%s1542_s2 + $0x78] sm:$0xff] }
 0x138   : > { %v374_v59 = vrot.slane %v373_v57, 2 }
 0x139   : > { %v381_v60 = vrot.slane %v380_v58, 2 }
 0x13a   : > { %v375_v61 = vadd.f32 %v374_v59, %v373_v57 }
 0x13b   : > { %v382_v62 = vadd.f32 %v381_v60, %v380_v58 }
 0x13c   : > { %v376_v63 = vrot.slane %v375_v61, 1 }
 0x13d   : > { %v383_v1 = vrot.slane %v382_v62, 1 }
 0x13e   : > { %v377_v2 = vadd.f32 %v376_v63, %v375_v61 }
 0x13f   : > { %v384_v3 = vadd.f32 %v383_v1, %v382_v62 }
 0x140   : > { %v386_v4 = vmul.f32 0.25, %v377_v2 }
 0x141   : > { %v387_v5 = vmul.f32 0.25, %v384_v3 }
 0x142   : > { %v388_v6 = vsub.f32 %v365_v50, %v386_v4  ;;  %v293_v50 = vld [vmem:[%s1542_s2 + $0x50] sm:$0xff] }
 0x143   : > { %v389_v7 = vsub.f32 %v367_v52, %v387_v5  ;;  %v295_v52 = vld [vmem:[%s1542_s2 + $0x60] sm:$0xff] }
 0x144   : > { %v390_v8 = vmul.f32 %v388_v6, %v388_v6 }
 0x145   : > { %v391_v9 = vmul.f32 %v389_v7, %v389_v7 }
 0x146   : > { %v392_v10 = vsel %vm370_vm0, %v390_v8, 0.0 }
 0x147   : > { %v393_v11 = vrot.slane %v392_v10, 4  ;;  %v399_v12 = vsel %vm370_vm0, %v391_v9, 0.0 }
 0x148   : > { %v400_v13 = vrot.slane %v399_v12, 4 }
 0x149   : > { %v394_v14 = vadd.f32 %v393_v11, %v392_v10 }
 0x14a   : > { %v401_v15 = vadd.f32 %v400_v13, %v399_v12 }
 0x14b   : > { %v395_v16 = vrot.slane %v394_v14, 2 }
 0x14c   : > { %v402_v17 = vrot.slane %v401_v15, 2 }
 0x14d   : > { %v396_v18 = vadd.f32 %v395_v16, %v394_v14 }
 0x14e   : > { %v403_v19 = vadd.f32 %v402_v17, %v401_v15 }
 0x14f   : > { %v397_v20 = vrot.slane %v396_v18, 1 }
 0x150   : > { %v404_v21 = vrot.slane %v403_v19, 1 }
 0x151   : > { %v398_v22 = vadd.f32 %v397_v20, %v396_v18 }
 0x152   : > { %v405_v23 = vadd.f32 %v404_v21, %v403_v19 }
 0x153   : > { %984 = vrsqrt.f32 %v398_v22  ;;  %vm408_vm1 = vcmp.eq.f32.partialorder %v398_v22, inf  ;;  %v411_v27 = vand.u32 2147483648, %v398_v22  ;;  %vm410_vm2 = vcmp.eq.f32.partialorder %v398_v22, 0.0 }
 0x154   : > { %986 = vrsqrt.f32 %v405_v23  ;;  %vm415_vm3 = vcmp.eq.f32.partialorder %v405_v23, inf  ;;  %v418_v30 = vand.u32 2147483648, %v405_v23  ;;  %vm417_vm4 = vcmp.eq.f32.partialorder %v405_v23, 0.0 }
 0x15d   : > { %v985_v24 = vpop.eup %984 }
 0x15e   : > { %v987_v25 = vpop.eup %986  ;;  %v407_v26 = vmul.f32 %v985_v24, %v398_v22 }
 0x15f   : > { %v414_v28 = vmul.f32 %v987_v25, %v405_v23 }
 0x160   : > { %v409_v29 = vsel %vm408_vm1, %v398_v22, %v407_v26 }
 0x161   : > { %v412_v31 = vsel %vm410_vm2, %v411_v27, %v409_v29  ;;  %v416_v32 = vsel %vm415_vm3, %v405_v23, %v414_v28 }
 0x162   : > { %v420_v33 = vadd.f32 1e-06, %v412_v31  ;;  %v419_v34 = vsel %vm417_vm4, %v418_v30, %v416_v32 }
 0x163   : > { %v421_v35 = vadd.f32 1e-06, %v419_v34 }
 0x164   : > { %988 = vrcp.f32 %v420_v33 }
 0x165   : > { %990 = vrcp.f32 %v421_v35 }
 0x16e   : > { %v989_v36 = vpop.eup %988 }
 0x16f   : > { %v991_v37 = vpop.eup %990  ;;  %v423_v39 = vmul.f32 %v989_v36, %v388_v6 }
 0x170   : > { %v425_v38 = vmul.f32 %v991_v37, %v389_v7 }
 0x172   : > { %849 = vmatprep.subr.msk.mxu0 %vm370_vm0, %v425_v38  ;;  %910 = vmatprep.subr.msk.mxu1 %vm370_vm0, %v425_v38 }
 0x173   : > { %850 = vmatpush1.msk.msra.mxu0 %vm370_vm0, %v423_v39  ;;  %911 = vmatpush1.msk.msra.mxu1 %vm370_vm0, %v423_v39 }
 0x174   : > { %854 = vmatmul.mubr.msk.f32.vlgmr.msra.gmra.mrb[0].mxu1 %vm426_vm5, %v286_v40  ;;  %851 = vmatmul.mubr.msk.f32.vlgmr.msra.gmra.mrb[2].mxu0 %vm426_vm5, %v283_v41 }
 0x175   : > { %569 = vmatprep.mubr.f32.mxu1 %v1141_v0  ;;  %551 = vmatprep.mubr.f32.mxu0 %v1141_v0 }
 0x178   : > { %855 = vmatmul.mubr.msk.f32.gmra.mrb[2].mxu1 %vm426_vm5, %v287_v42  ;;  %852 = vmatmul.mubr.msk.f32.gmra.mrb[4].mxu0 %vm426_vm5, %v284_v43 }
 0x179   : > { %575 = vmatprep.mubr.f32.mxu1 %v1141_v0  ;;  %557 = vmatprep.mubr.f32.mxu0 %v1141_v0 }
 0x17c   : > { %856 = vmatmul.mubr.msk.f32.gmra.mrb[4].mxu1 %vm426_vm5, %v288_v44  ;;  %853 = vmatmul.mubr.msk.f32.gmra.mrb[6].mxu0 %vm426_vm5, %v285_v45 }
 0x17d   : > { %581 = vmatprep.mubr.f32.mxu1 %v1141_v0 }
 0x180   : > { %857 = vmatmul.mubr.msk.f32.gmra.mrb[6].mxu1 %vm426_vm5, %v289_v46 }
 0x181   : > { %587 = vmatprep.mubr.f32.mxu1 %v1141_v0 }
 0x184   : > { %858 = vmatmul.mubr.msk.f32.gmra.mrb[8].mxu1 %vm426_vm5, %v290_v47 }
 0x185   : > { %593 = vmatprep.mubr.f32.mxu1 %v1141_v0 }
 0x188   : > { %859 = vmatmul.mubr.msk.f32.gmra.mrb[10].mxu1 %vm426_vm5, %v291_v48 }
 0x189   : > { %599 = vmatprep.mubr.f32.mxu1 %v1141_v0 }
 0x18c   : > { %860 = vmatmul.mubr.msk.f32.gmra.mrb[12].mxu1 %vm426_vm5, %v292_v49 }
 0x18d   : > { %605 = vmatprep.mubr.f32.mxu1 %v1141_v0 }
 0x190   : > { %861 = vmatmul.mubr.msk.f32.gmra.mrb[14].mxu1 %vm426_vm5, %v293_v50 }
 0x191   : > { %611 = vmatprep.mubr.f32.mxu1 %v1141_v0 }
 0x194   : > { %862 = vmatmul.mubr.msk.f32.gmra.mrb[16].mxu1 %vm426_vm5, %v294_v51 }
 0x195   : > { %617 = vmatprep.mubr.f32.mxu1 %v1141_v0 }
 0x198   : > { %863 = vmatmul.mubr.msk.f32.gmra.mrb[18].mxu1 %vm426_vm5, %v295_v52 }
 0x199   : > { %623 = vmatprep.mubr.f32.mxu1 %v1141_v0 }
 0x19c   : > { %864 = vmatmul.mubr.msk.f32.gmra.mrb[20].mxu1 %vm426_vm5, %v296_v53 }
 0x19d   : > { %629 = vmatprep.mubr.f32.mxu1 %v1141_v0 }
 0x1a0   : > { %865 = vmatmul.mubr.msk.f32.gmra.mrb[22].mxu1 %vm426_vm5, %v297_v54 }
 0x1a1   : > { %635 = vmatprep.mubr.f32.mxu1 %v1141_v0 }
 0x1a4   : > { %866 = vmatmul.mubr.msk.f32.gmra.mrb[24].mxu1 %vm426_vm5, %v298_v55 }
 0x1a5   : > { %1035 = shalt.err (!%p1032_p5)
}
 0x1a6   : > { %s1036_s13 = scalar_lea.hbm %s1428_s27, 128  ;;  %s1040_s9 = scalar_lea.hbm %s1544_s4, 256 }
 0x1a7   : > { %p1037_p4 = scmp.ne.s32.totalorder %s1428_s27, %s1036_s13  ;;  %p1041_p12 = scmp.lt.u32.totalorder %s1428_s27, %s1544_s4 }
 0x1a8   : > { %p1042_p1 = scmp.lt.u32.totalorder %s1040_s9, %s1036_s13  ;;  %p1044_p8 = scmp.lt.u32.totalorder %s1036_s13, %s1428_s27 }
 0x1a9   : > { %p1038_p7 = pnand %p1037_p4, %p1552_p9 }
 0x1aa   : > { %p1043_p3 = por %p1042_p1, %p1041_p12 }
 0x1ab   : > { %p1039_p10 = pneg %p1038_p7 }
 0x1ac   : > { %p1045_p11 = por %p1044_p8, %p1043_p3 }
 0x1ae   : > { %p1046_p0 = pnand %p1045_p11, %p1039_p10 }
 0x1b0   : > { %1049 = shalt.err (!%p1046_p0)
}
 0x1b1   : > { %915 = dma.vmem_to_hbm [thread:$0]  (%p1552_p9), %s720_s21, 128, %s1428_s27, %s685_s10  }
 0x1b2   : > { %s1450_s26 = scalar_lea.vmem [#allocation5], %s846_s24  ;;  %s876_s24 = sshll.u32 %s1128_s18, 12 }
 0x1b3   : > { %s700_s21 = sshll.u32 %s1450_s26, 4  ;;  %s1487_s12 = scalar_lea.hbm %s1543_s3, %s876_s24  ;;  %s1489_s21 = int_to_ptr.vmem [resolvable:$true] %s700_s21 }
 0x1b4   : > { %s680_s14 = scalar_lea.sflag [#allocation4], %s1283_s22  ;;  %s1050_s18 = scalar_lea.vmem %s1489_s21, 4096 }
 0x1b5   : > { %p1051_p6 = scmp.ne.s32.totalorder %s1489_s21, %s1050_s18  ;;  %s1143_s6 = smov [#allocation5]  }
 0x1b6   : > { %s1054_s5 = sshll.u32 %s1143_s6, 4  ;;  %s1055_s5 = int_to_ptr.vmem [resolvable:$false] %s1054_s5 }
 0x1b7   : > { %p1052_p13 = pnand %p1051_p6, %p1552_p9  ;;  %s1056_s13 = scalar_lea.vmem %s1055_s5, 8192 }
 0x1b8   : > { %p1057_p5 = scmp.lt.s32.totalorder %s1489_s21, %s1055_s5  ;;  %p1058_p4 = scmp.lt.s32.totalorder %s1056_s13, %s1050_s18 }
 0x1b9   : > { %p1053_p2 = pneg %p1052_p13 }
 0x1ba   : > { %p1059_p7 = por %p1058_p4, %p1057_p5 }
 0x1bc   : > { %p1060_p10 = pnand %p1059_p7, %p1053_p2 }
 0x247   : > { %v565_v0 = vpop.f32.mrb[0].mxu1  ;;  %v547_v56 = vpop.f32.mrb[2].mxu0 }
 0x248   : > { %648 = vst [vmem:[%s1450_s26 + $0x30] sm:$0xff] %v565_v0  ;;  %v567_v57 = vpop.f32.mrb[1].mxu1  ;;  %642 = vst [vmem:[%s1450_s26] sm:$0xff] %v547_v56  ;;  %v549_v58 = vpop.f32.mrb[3].mxu0 }
 0x249   : > { %649 = vst [vmem:[%s1450_s26 + $0x38] sm:$0xff] %v567_v57  ;;  %643 = vst [vmem:[%s1450_s26 + $0x8] sm:$0xff] %v549_v58 }
 0x24b   : > { %v571_v59 = vpop.f32.mrb[2].mxu1  ;;  %v553_v60 = vpop.f32.mrb[4].mxu0 }
 0x24c   : > { %650 = vst [vmem:[%s1450_s26 + $0x40] sm:$0xff] %v571_v59  ;;  %v573_v61 = vpop.f32.mrb[3].mxu1  ;;  %644 = vst [vmem:[%s1450_s26 + $0x10] sm:$0xff] %v553_v60  ;;  %v555_v62 = vpop.f32.mrb[5].mxu0 }
 0x24d   : > { %651 = vst [vmem:[%s1450_s26 + $0x48] sm:$0xff] %v573_v61  ;;  %645 = vst [vmem:[%s1450_s26 + $0x18] sm:$0xff] %v555_v62 }
 0x24f   : > { %v577_v63 = vpop.f32.mrb[4].mxu1  ;;  %v559_v1 = vpop.f32.mrb[6].mxu0 }
 0x250   : > { %652 = vst [vmem:[%s1450_s26 + $0x50] sm:$0xff] %v577_v63  ;;  %v579_v2 = vpop.f32.mrb[5].mxu1  ;;  %646 = vst [vmem:[%s1450_s26 + $0x20] sm:$0xff] %v559_v1  ;;  %v561_v3 = vpop.f32.mrb[7].mxu0 }
 0x251   : > { %653 = vst [vmem:[%s1450_s26 + $0x58] sm:$0xff] %v579_v2  ;;  %647 = vst [vmem:[%s1450_s26 + $0x28] sm:$0xff] %v561_v3 }
 0x253   : > { %v583_v4 = vpop.f32.mrb[6].mxu1 }
 0x254   : > { %654 = vst [vmem:[%s1450_s26 + $0x60] sm:$0xff] %v583_v4  ;;  %v585_v5 = vpop.f32.mrb[7].mxu1 }
 0x255   : > { %655 = vst [vmem:[%s1450_s26 + $0x68] sm:$0xff] %v585_v5 }
 0x257   : > { %v589_v6 = vpop.f32.mrb[8].mxu1 }
 0x258   : > { %656 = vst [vmem:[%s1450_s26 + $0x70] sm:$0xff] %v589_v6  ;;  %v591_v7 = vpop.f32.mrb[9].mxu1 }
 0x259   : > { %657 = vst [vmem:[%s1450_s26 + $0x78] sm:$0xff] %v591_v7 }
 0x25b   : > { %v595_v8 = vpop.f32.mrb[10].mxu1 }
 0x25c   : > { %658 = vst [vmem:[%s1450_s26 + $0x80] sm:$0xff] %v595_v8  ;;  %v597_v9 = vpop.f32.mrb[11].mxu1 }
 0x25d   : > { %659 = vst [vmem:[%s1450_s26 + $0x88] sm:$0xff] %v597_v9 }
 0x25f   : > { %v601_v10 = vpop.f32.mrb[12].mxu1 }
 0x260   : > { %660 = vst [vmem:[%s1450_s26 + $0x90] sm:$0xff] %v601_v10  ;;  %v603_v11 = vpop.f32.mrb[13].mxu1 }
 0x261   : > { %661 = vst [vmem:[%s1450_s26 + $0x98] sm:$0xff] %v603_v11 }
 0x263   : > { %v607_v12 = vpop.f32.mrb[14].mxu1 }
 0x264   : > { %662 = vst [vmem:[%s1450_s26 + $0xa0] sm:$0xff] %v607_v12  ;;  %v609_v13 = vpop.f32.mrb[15].mxu1 }
 0x265   : > { %663 = vst [vmem:[%s1450_s26 + $0xa8] sm:$0xff] %v609_v13 }
 0x267   : > { %v613_v14 = vpop.f32.mrb[16].mxu1 }
 0x268   : > { %664 = vst [vmem:[%s1450_s26 + $0xb0] sm:$0xff] %v613_v14  ;;  %v615_v15 = vpop.f32.mrb[17].mxu1 }
 0x269   : > { %665 = vst [vmem:[%s1450_s26 + $0xb8] sm:$0xff] %v615_v15 }
 0x26b   : > { %v619_v16 = vpop.f32.mrb[18].mxu1 }
 0x26c   : > { %666 = vst [vmem:[%s1450_s26 + $0xc0] sm:$0xff] %v619_v16  ;;  %v621_v17 = vpop.f32.mrb[19].mxu1 }
 0x26d   : > { %667 = vst [vmem:[%s1450_s26 + $0xc8] sm:$0xff] %v621_v17 }
 0x26f   : > { %v625_v18 = vpop.f32.mrb[20].mxu1 }
 0x270   : > { %668 = vst [vmem:[%s1450_s26 + $0xd0] sm:$0xff] %v625_v18  ;;  %v627_v19 = vpop.f32.mrb[21].mxu1 }
 0x271   : > { %669 = vst [vmem:[%s1450_s26 + $0xd8] sm:$0xff] %v627_v19 }
 0x273   : > { %v631_v20 = vpop.f32.mrb[22].mxu1 }
 0x274   : > { %670 = vst [vmem:[%s1450_s26 + $0xe0] sm:$0xff] %v631_v20  ;;  %v633_v21 = vpop.f32.mrb[23].mxu1 }
 0x275   : > { %671 = vst [vmem:[%s1450_s26 + $0xe8] sm:$0xff] %v633_v21 }
 0x277   : > { %v637_v22 = vpop.f32.mrb[24].mxu1 }
 0x278   : > { %672 = vst [vmem:[%s1450_s26 + $0xf0] sm:$0xff] %v637_v22  ;;  %v639_v23 = vpop.f32.mrb[25].mxu1 }
 0x279   : > { %673 = vst [vmem:[%s1450_s26 + $0xf8] sm:$0xff] %v639_v23 }
 0x27a   : > { %1063 = shalt.err (!%p1060_p10)
}
 0x27b   : > { %s1064_s7 = scalar_lea.hbm %s1487_s12, 4096  ;;  %s1068_s11 = scalar_lea.hbm %s1543_s3, 8192 }
 0x27c   : > { %p1065_p12 = scmp.ne.s32.totalorder %s1487_s12, %s1064_s7  ;;  %p1069_p8 = scmp.lt.u32.totalorder %s1487_s12, %s1543_s3 }
 0x27d   : > { %p1070_p11 = scmp.lt.u32.totalorder %s1068_s11, %s1064_s7  ;;  %p1072_p6 = scmp.lt.u32.totalorder %s1064_s7, %s1487_s12 }
 0x27e   : > { %p1066_p1 = pnand %p1065_p12, %p1552_p9 }
 0x27f   : > { %p1071_p0 = por %p1070_p11, %p1069_p8 }
 0x280   : > { %p1067_p3 = pneg %p1066_p1 }
 0x281   : > { %p1073_p13 = por %p1072_p6, %p1071_p0 }
 0x283   : > { %p1074_p2 = pnand %p1073_p13, %p1067_p3 }
 0x285   : > { %1077 = shalt.err (!%p1074_p2)
}
 0x286   : > { %s1144_s24 = smov 256   ;;  %s1145_s27 = smov 16  }
 0x287   : > { %914 = dma.vmem_to_hbm [thread:$0]  (%p1552_p9), %s1489_s21, 4096, %s1487_s12, %s680_s14, %s1144_s24, %s1144_s24, %s1145_s27  }
 0x288 PF: > { %s731_s10 = sand.u32 1, %s1116_s15   ;;  %p1553_p5 = scmp.ne.s32.totalorder %s1549_s30, 0 }
 0x289   : > { %p1554_p4 = scmp.ge.s32.totalorder %s1136_s20, 2  ;;  %s732_s18 = scalar_lea.sflag [#allocation4], %s731_s10 }
 0x28b   : > { %p923_p7 = pnand %p1554_p4, %p1553_p5 }
 0x28d   : > { %1107 = dma.done.wait (!%p923_p7), %s732_s18, 4096  }
 0x28e   : > { %1109 = vsyncadd (!%p923_p7), %s732_s18, 4294963200  ;;  %s741_s6 = scalar_lea.sflag [#allocation7], %s731_s10 }
 0x28f   : > { %1111 = dma.done.wait (!%p923_p7), %s741_s6, 128  }
 0x290   : > { %1113 = vsyncadd (!%p923_p7), %s741_s6, 4294967168  ;;  %s24_s20 = sadd.s32 1, %s1136_s20   ;;  %s1555_s15 = smov %s1120_s16 }
 0x291   : > { %p21_p10 = scmp.ge.s32.totalorder %s24_s20, 4   ;;  %s1556_s16 = smov %s1124_s17 }
 0x292   : > { %s1557_s17 = smov %s1227_s29  ;;  %s1558_s18 = smov %s1132_s19 }
 0x293   : > { %s1559_s19 = smov %s1561_s23  ;;  %23 = sbr.rel (!%p21_p10) target bundleno = 8 (0x8), region = 94 }
 0x29a   :  { %746 = vsyncpa [#allocation3], 1 }
 0x29b   :  { %748 = vsyncpa [#allocation3 + $0x1], 1 }
 0x29c   :  { %749 = vsyncpa [#allocation4], 1 }
 0x29d   :  { %751 = vsyncpa [#allocation4 + $0x1], 1 }
 0x29e   :  { %752 = vsyncpa [#allocation7], 1 }
 0x29f   :  { %754 = vsyncpa [#allocation7 + $0x1], 1 }

</bundles_post_ra>
